<compile_context>
chip_gen: v7x
topology: tpu7x:2x2x1
jax: 0.10.0
libtpu: 0.0.40
codegen_flags: <defaults>
</compile_context>

<pallas_src>
import functools

import jax
import jax.numpy as jnp
from jax.experimental import pallas as pl
from jax.experimental.pallas import tpu as pltpu

IMAGE_SIZE = 16      # self.opt.image_size (small test shape)
NECK_IDS = 12
BODY_FACTOR = 1.2


# ----------------------------------------------------------------------------
# In-kernel erosion helper (lane-dense (N, H*W) layout, roll-based shifts)
# ----------------------------------------------------------------------------
def _erode_masks_flat(bg, h, w):
    """3x3 and 15x15 box erosions (pad value 1.0) of flattened (N, H*W) maps.

    Separable min-erosion with radius doubling:
        W_1[j] = min(v[j-1], v[j], v[j+1])
        W_3[j] = min(W_1[j-2], W_1[j], W_1[j+2])
        W_7[j] = min(W_3[j-4], W_3[j], W_3[j+4])   (-> 15-wide window)
    Horizontal pass runs directly in the flattened layout; vertical pass shifts
    by whole rows.  Every shift is a pltpu.roll (XLU, vreg-resident) masked by
    constant boundary masks that inject the erosion pad value (1.0) at row /
    image edges -- the same masks also kill roll's circular wraparound.

    NOTE: min-erosion equals util.morph's `box_sum == ks*ks` test only for
    binary {0,1} masks (true for the renderer's background channel), and relies
    on the pad value 1.0 being the neutral element of min over that domain.
    """
    hw = h * w
    lane = jax.lax.broadcasted_iota(jnp.int32, (1, hw), 1)   # flat pixel index
    col = lane % w                                            # in-row column

    # Constant validity masks, computed once (constant-foldable iota compares):
    #   keep_lo: pulling from j - s stays inside the image / row
    #   keep_hi: pulling from j + s stays inside the image / row
    hmask = {s: (col >= s, col < (w - s)) for s in (1, 2, 4)}            # in-row
    vmask = {s: (lane >= s * w, lane < (hw - s * w)) for s in (1, 2, 4)}  # rows

    def win_min(v, s, keep_lo, keep_hi):
        # min over {v[j-s], v[j], v[j+s]} with out-of-image -> 1.0.
        # pltpu.roll follows jnp.roll semantics; amounts kept non-negative.
        from_hi = jnp.where(keep_hi, pltpu.roll(v, hw - s, axis=1), 1.0)  # v[j+s]
        from_lo = jnp.where(keep_lo, pltpu.roll(v, s, axis=1), 1.0)       # v[j-s]
        return jnp.minimum(v, jnp.minimum(from_hi, from_lo))

    def hpass(v, s):
        return win_min(v, s, *hmask[s])

    def vpass(v, s):
        return win_min(v, s * w, *vmask[s])

    r1 = hpass(bg, 1)                          # 1x3   (shared first level)
    r7 = hpass(hpass(r1, 2), 4)                # 1x15
    crop3 = vpass(r1, 1)                       # 3x3   -> src_crop_mask
    bg15 = vpass(vpass(vpass(r7, 1), 2), 4)    # 15x15 -> src_bg_mask
    return crop3, bg15


# ----------------------------------------------------------------------------
# Single fused kernel: erosions + compositing into one output slab + bboxes
# ----------------------------------------------------------------------------
def _body_recovery_kernel(img_ref, cond_ref, bg_ref, kps_ref,
                          slab_ref, bbox_ref, *, n, c, cc, h, w, image_size):
    img = img_ref[...]       # (N*C,  H*W)  lane-dense, batch-major rows
    cond = cond_ref[...]     # (N*Cc, H*W)
    bg = bg_ref[...]         # (N,    H*W)  background channel, binary {0,1}

    # --- util.morph(cond[:, -1:], ks=3/15, mode='erode') ---
    crop_mask, bg_mask = _erode_masks_flat(bg, h, w)

    # --- build the fused (24, H*W) output slab in vregs, store once ---
    # rows [0, N)                : src_crop_mask
    # rows [N, 2N)               : src_bg_mask
    # rows [2N, 2N + N*(C+Cc))   : input_G_src   (per batch: [img*(1-crop), cond])
    # remaining N*(C+1) rows     : input_G_src_bg (per batch: [img*bg, bg])
    pieces = [crop_mask, bg_mask]
    for i in range(n):
        inv = 1.0 - crop_mask[i:i + 1]                       # (1, HW)
        pieces.append(img[i * c:(i + 1) * c] * inv)          # (C, HW)
        pieces.append(cond[i * cc:(i + 1) * cc])             # (Cc, HW)
    for i in range(n):
        m = bg_mask[i:i + 1]
        pieces.append(img[i * c:(i + 1) * c] * m)
        pieces.append(m)
    slab_ref[...] = jnp.concatenate(pieces, axis=0)          # (24, HW) unmasked

    # --- cal_head_bbox / cal_body_bbox, merged into one (N, 8) int32 output ---
    kxy = kps_ref[...]                        # (2, N, 19)
    kx = (kxy[0] + 1.0) * 0.5                 # (N, 19) in [0, 1]
    ky = (kxy[1] + 1.0) * 0.5

    hx = kx[:, NECK_IDS:]
    hy = ky[:, NECK_IDS:]
    h_min_x = jnp.maximum(jnp.min(hx - 0.05, axis=1, keepdims=True), 0.0)
    h_max_x = jnp.minimum(jnp.max(hx + 0.05, axis=1, keepdims=True), 1.0)
    h_min_y = jnp.maximum(jnp.min(hy - 0.05, axis=1, keepdims=True), 0.0)
    h_max_y = jnp.minimum(jnp.max(hy, axis=1, keepdims=True), 1.0)
    # NOTE: some versions of cal_head_bbox also return a validity flag; the
    #       reference given here returns only the rects.

    b_min_x = jnp.min(kx, axis=1, keepdims=True)
    b_max_x = jnp.max(kx, axis=1, keepdims=True)
    mid_x = (b_min_x + b_max_x) * 0.5
    wid = (b_max_x - b_min_x) * BODY_FACTOR
    b_lo_x = jnp.maximum(0.0, mid_x - wid * 0.5)
    b_hi_x = jnp.minimum(1.0, mid_x + wid * 0.5)
    b_min_y = jnp.min(ky, axis=1, keepdims=True)
    b_max_y = jnp.max(ky, axis=1, keepdims=True)
    mid_y = (b_min_y + b_max_y) * 0.5
    hei = (b_max_y - b_min_y) * BODY_FACTOR
    b_lo_y = jnp.maximum(0.0, mid_y - hei * 0.5)
    b_hi_y = jnp.minimum(1.0, mid_y + hei * 0.5)

    bbox = jnp.concatenate(
        [h_min_x, h_max_x, h_min_y, h_max_y, b_lo_x, b_hi_x, b_lo_y, b_hi_y],
        axis=1) * image_size
    bbox_ref[...] = bbox.astype(jnp.int32)    # torch .long(): trunc (values >= 0)


@functools.partial(jax.jit, static_argnames=("image_size",))
def body_recovery_flow(src_img, src_cond, kps, *, image_size=IMAGE_SIZE):
    """Returns (src_crop_mask, src_bg_mask, input_G_src, input_G_src_bg,
                head_bbox, body_bbox)."""
    n, c, h, w = src_img.shape
    cc = src_cond.shape[1]
    hw = h * w
    total = n * (1 + 1 + (c + cc) + (c + 1))

    # Wrapper-side layout plumbing (cheap XLA metadata ops / tiny copies);
    # everything the kernel touches is lane-dense (last dim = H*W = 256).
    img2 = src_img.reshape(n * c, hw)
    cond2 = src_cond.reshape(n * cc, hw)
    bg_in = src_cond[:, -1, :, :].reshape(n, hw)
    kps_t = jnp.transpose(kps, (2, 0, 1))          # (2, N, 19)

    kernel = functools.partial(_body_recovery_kernel, n=n, c=c, cc=cc, h=h, w=w,
                               image_size=float(image_size))

    # Grid-less call: whole (tiny) problem lives in VMEM at once; no grid ->
    # no double-buffering / prologue machinery for a single step.
    slab, bbox = pl.pallas_call(
        kernel,
        out_shape=(jax.ShapeDtypeStruct((total, hw), jnp.float32),  # fused slab
                   jax.ShapeDtypeStruct((n, 8), jnp.int32)),        # head+body bbox
        in_specs=[pl.BlockSpec(memory_space=pltpu.MemorySpace.VMEM)] * 4,
        out_specs=(pl.BlockSpec(memory_space=pltpu.MemorySpace.VMEM),
                   pl.BlockSpec(memory_space=pltpu.MemorySpace.VMEM)),
    )(img2, cond2, bg_in, kps_t)

    # Split the slab back (wrapper-side reshapes/slices only).
    o = 0
    src_crop_mask = slab[o:o + n].reshape(n, 1, h, w); o += n
    src_bg_mask = slab[o:o + n].reshape(n, 1, h, w); o += n
    input_G_src = slab[o:o + n * (c + cc)].reshape(n, c + cc, h, w)
    o += n * (c + cc)
    input_G_src_bg = slab[o:o + n * (c + 1)].reshape(n, c + 1, h, w)
    head_bbox = bbox[:, 0:4]
    body_bbox = bbox[:, 4:8]
    return (src_crop_mask, src_bg_mask, input_G_src, input_G_src_bg,
            head_bbox, body_bbox)


# ----------------------------------------------------------------------------
# Plain-JAX references (correctness sanity check)
# ----------------------------------------------------------------------------
def _erode_ref(mask, ks):
    p = ks // 2
    padded = jnp.pad(mask, ((0, 0), (0, 0), (p, p), (p, p)), constant_values=1.0)
    s = jax.lax.reduce_window(padded, 0.0, jax.lax.add,
                              (1, 1, ks, ks), (1, 1, 1, 1), 'VALID')
    return (s == float(ks * ks)).astype(jnp.float32)


def _forward_ref(src_img, src_cond):
    bg = src_cond[:, -1:, :, :]
    crop_mask = _erode_ref(bg, 3)
    bg_mask = _erode_ref(bg, 15)
    g_src = jnp.concatenate([src_img * (1.0 - crop_mask), src_cond], axis=1)
    g_src_bg = jnp.concatenate([src_img * bg_mask, bg_mask], axis=1)
    return crop_mask, bg_mask, g_src, g_src_bg


def _head_bbox_ref(kps, image_size=IMAGE_SIZE):
    k = (kps + 1.0) * 0.5
    hx = k[:, NECK_IDS:, 0]
    hy = k[:, NECK_IDS:, 1]
    min_x = jnp.maximum(jnp.min(hx - 0.05, axis=1), 0.0)
    max_x = jnp.minimum(jnp.max(hx + 0.05, axis=1), 1.0)
    min_y = jnp.maximum(jnp.min(hy - 0.05, axis=1), 0.0)
    max_y = jnp.minimum(jnp.max(hy, axis=1), 1.0)
    return (jnp.stack([min_x, max_x, min_y, max_y], axis=1)
            * float(image_size)).astype(jnp.int32)


def _body_bbox_ref(kps, image_size=IMAGE_SIZE, factor=BODY_FACTOR):
    k = (kps + 1.0) * 0.5
    kx, ky = k[:, :, 0], k[:, :, 1]
    min_x, max_x = jnp.min(kx, axis=1), jnp.max(kx, axis=1)
    mid_x = (min_x + max_x) * 0.5
    width = (max_x - min_x) * factor
    lo_x = jnp.maximum(0.0, mid_x - width * 0.5)
    hi_x = jnp.minimum(1.0, mid_x + width * 0.5)
    min_y, max_y = jnp.min(ky, axis=1), jnp.max(ky, axis=1)
    mid_y = (min_y + max_y) * 0.5
    height = (max_y - min_y) * factor
    lo_y = jnp.maximum(0.0, mid_y - height * 0.5)
    hi_y = jnp.minimum(1.0, mid_y + height * 0.5)
    return (jnp.stack([lo_x, hi_x, lo_y, hi_y], axis=1)
            * float(image_size)).astype(jnp.int32)


# ----------------------------------------------------------------------------
if __name__ == "__main__":
    key = jax.random.PRNGKey(0)
    k_img, k_body, k_uv, k_kps = jax.random.split(key, 4)

    N, C, H, W = 2, 3, IMAGE_SIZE, IMAGE_SIZE

    # Source image in [-1, 1]
    src_img = jax.random.uniform(k_img, (N, C, H, W), jnp.float32, -1.0, 1.0)

    # Synthetic renderer output: 2 uv/seg channels + binary background mask
    body_fg = (jax.random.uniform(k_body, (N, 1, H, W)) > 0.35).astype(jnp.float32)
    bg_mask_channel = 1.0 - body_fg
    uv_channels = jax.random.uniform(k_uv, (N, 2, H, W), jnp.float32, -1.0, 1.0)
    src_cond = jnp.concatenate([uv_channels, bg_mask_channel], axis=1)

    # Synthetic keypoints in [-1, 1]
    kps = jax.random.uniform(k_kps, (N, 19, 2), jnp.float32, -1.0, 1.0)

    # Run the fused Pallas kernel
    outs = jax.block_until_ready(body_recovery_flow(src_img, src_cond, kps))
    crop_mask, bg_mask, input_G_src, input_G_src_bg, head_bbox, body_bbox = outs

    # Sanity check against the plain-JAX reference
    r_crop, r_bg, r_g_src, r_g_src_bg = _forward_ref(src_img, src_cond)
    assert jnp.allclose(crop_mask, r_crop), "src_crop_mask mismatch"
    assert jnp.allclose(bg_mask, r_bg), "src_bg_mask mismatch"
    assert jnp.allclose(input_G_src, r_g_src), "input_G_src mismatch"
    assert jnp.allclose(input_G_src_bg, r_g_src_bg), "input_G_src_bg mismatch"
    assert jnp.array_equal(head_bbox, _head_bbox_ref(kps)), "head_bbox mismatch"
    assert jnp.array_equal(body_bbox, _body_bbox_ref(kps)), "body_bbox mismatch"

    print("KERNEL_OK")
</pallas_src>

<mosaic_0001>
module attributes {stable_mosaic.version = 11 : i64} {
  func.func @_body_recovery_kernel(%arg0: memref<6x256xf32, #tpu.memory_space<vmem>>, %arg1: memref<6x256xf32, #tpu.memory_space<vmem>>, %arg2: memref<2x256xf32, #tpu.memory_space<vmem>>, %arg3: memref<2x2x19xf32, #tpu.memory_space<vmem>>, %arg4: memref<24x256xf32, #tpu.memory_space<vmem>>, %arg5: memref<2x8xi32, #tpu.memory_space<vmem>>) attributes {dimension_semantics = [], scalar_prefetch = 0 : i64, scratch_operands = 0 : i64, tpu.core_type = #tpu.core_type<tc>} {
    %c0 = arith.constant 0 : index
    %c0_0 = arith.constant 0 : index
    %0 = vector.load %arg0[%c0, %c0_0] : memref<6x256xf32, #tpu.memory_space<vmem>>, vector<6x256xf32>
    %c0_1 = arith.constant 0 : index
    %c0_2 = arith.constant 0 : index
    %1 = vector.load %arg1[%c0_1, %c0_2] : memref<6x256xf32, #tpu.memory_space<vmem>>, vector<6x256xf32>
    %c0_3 = arith.constant 0 : index
    %c0_4 = arith.constant 0 : index
    %2 = vector.load %arg2[%c0_3, %c0_4] : memref<2x256xf32, #tpu.memory_space<vmem>>, vector<2x256xf32>
    %3 = tpu.iota {dimensions = array<i32: 1>} : vector<1x256xi32>
    %c16_i32 = arith.constant 16 : i32
    %c0_i32 = arith.constant 0 : i32
    %4 = arith.cmpi eq, %c16_i32, %c0_i32 : i32
    %c1_i32 = arith.constant 1 : i32
    %5 = arith.select %4, %c1_i32, %c16_i32 : i32
    %6 = vector.broadcast %5 : i32 to vector<1x256xi32>
    %7 = arith.remsi %3, %6 : vector<1x256xi32>
    %c0_i32_5 = arith.constant 0 : i32
    %8 = vector.broadcast %c0_i32_5 : i32 to vector<1x256xi32>
    %9 = arith.cmpi ne, %7, %8 : vector<1x256xi32>
    %c0_i32_6 = arith.constant 0 : i32
    %10 = vector.broadcast %c0_i32_6 : i32 to vector<1x256xi32>
    %11 = arith.cmpi slt, %7, %10 : vector<1x256xi32>
    %c0_i32_7 = arith.constant 0 : i32
    %12 = arith.cmpi slt, %5, %c0_i32_7 : i32
    %13 = vector.broadcast %12 : i1 to vector<1x256xi1>
    %14 = vector.broadcast %13 : vector<1x256xi1> to vector<1x256xi1>
    %15 = arith.xori %11, %14 : vector<1x256xi1>
    %16 = arith.andi %15, %9 : vector<1x256xi1>
    %17 = vector.broadcast %5 : i32 to vector<1x256xi32>
    %18 = arith.addi %7, %17 : vector<1x256xi32>
    %19 = arith.select %16, %18, %7 : vector<1x256xi1>, vector<1x256xi32>
    %c1_i32_8 = arith.constant 1 : i32
    %20 = vector.broadcast %c1_i32_8 : i32 to vector<1x256xi32>
    %21 = arith.cmpi sge, %19, %20 : vector<1x256xi32>
    %c15_i32 = arith.constant 15 : i32
    %22 = vector.broadcast %c15_i32 : i32 to vector<1x256xi32>
    %23 = arith.cmpi slt, %19, %22 : vector<1x256xi32>
    %c2_i32 = arith.constant 2 : i32
    %24 = vector.broadcast %c2_i32 : i32 to vector<1x256xi32>
    %25 = arith.cmpi sge, %19, %24 : vector<1x256xi32>
    %c14_i32 = arith.constant 14 : i32
    %26 = vector.broadcast %c14_i32 : i32 to vector<1x256xi32>
    %27 = arith.cmpi slt, %19, %26 : vector<1x256xi32>
    %c4_i32 = arith.constant 4 : i32
    %28 = vector.broadcast %c4_i32 : i32 to vector<1x256xi32>
    %29 = arith.cmpi sge, %19, %28 : vector<1x256xi32>
    %c12_i32 = arith.constant 12 : i32
    %30 = vector.broadcast %c12_i32 : i32 to vector<1x256xi32>
    %31 = arith.cmpi slt, %19, %30 : vector<1x256xi32>
    %c16_i32_9 = arith.constant 16 : i32
    %32 = vector.broadcast %c16_i32_9 : i32 to vector<1x256xi32>
    %33 = arith.cmpi sge, %3, %32 : vector<1x256xi32>
    %c240_i32 = arith.constant 240 : i32
    %34 = vector.broadcast %c240_i32 : i32 to vector<1x256xi32>
    %35 = arith.cmpi slt, %3, %34 : vector<1x256xi32>
    %c32_i32 = arith.constant 32 : i32
    %36 = vector.broadcast %c32_i32 : i32 to vector<1x256xi32>
    %37 = arith.cmpi sge, %3, %36 : vector<1x256xi32>
    %c224_i32 = arith.constant 224 : i32
    %38 = vector.broadcast %c224_i32 : i32 to vector<1x256xi32>
    %39 = arith.cmpi slt, %3, %38 : vector<1x256xi32>
    %c64_i32 = arith.constant 64 : i32
    %40 = vector.broadcast %c64_i32 : i32 to vector<1x256xi32>
    %41 = arith.cmpi sge, %3, %40 : vector<1x256xi32>
    %c192_i32 = arith.constant 192 : i32
    %42 = vector.broadcast %c192_i32 : i32 to vector<1x256xi32>
    %43 = arith.cmpi slt, %3, %42 : vector<1x256xi32>
    %c255_i32 = arith.constant 255 : i32
    %44 = tpu.dynamic_rotate %2 by %c255_i32 dim 1 : vector<2x256xf32>, i32 -> vector<2x256xf32>
    %cst = arith.constant 1.000000e+00 : f32
    %45 = vector.shape_cast %23 : vector<1x256xi1> to vector<1x256xi1>
    %46 = vector.broadcast %45 : vector<1x256xi1> to vector<2x256xi1>
    %47 = vector.broadcast %cst : f32 to vector<2x256xf32>
    %48 = arith.select %46, %44, %47 : vector<2x256xi1>, vector<2x256xf32>
    %c1_i32_10 = arith.constant 1 : i32
    %49 = tpu.dynamic_rotate %2 by %c1_i32_10 dim 1 : vector<2x256xf32>, i32 -> vector<2x256xf32>
    %cst_11 = arith.constant 1.000000e+00 : f32
    %50 = vector.shape_cast %21 : vector<1x256xi1> to vector<1x256xi1>
    %51 = vector.broadcast %50 : vector<1x256xi1> to vector<2x256xi1>
    %52 = vector.broadcast %cst_11 : f32 to vector<2x256xf32>
    %53 = arith.select %51, %49, %52 : vector<2x256xi1>, vector<2x256xf32>
    %54 = arith.minimumf %48, %53 : vector<2x256xf32>
    %55 = arith.minimumf %2, %54 : vector<2x256xf32>
    %c254_i32 = arith.constant 254 : i32
    %56 = tpu.dynamic_rotate %55 by %c254_i32 dim 1 : vector<2x256xf32>, i32 -> vector<2x256xf32>
    %cst_12 = arith.constant 1.000000e+00 : f32
    %57 = vector.shape_cast %27 : vector<1x256xi1> to vector<1x256xi1>
    %58 = vector.broadcast %57 : vector<1x256xi1> to vector<2x256xi1>
    %59 = vector.broadcast %cst_12 : f32 to vector<2x256xf32>
    %60 = arith.select %58, %56, %59 : vector<2x256xi1>, vector<2x256xf32>
    %c2_i32_13 = arith.constant 2 : i32
    %61 = tpu.dynamic_rotate %55 by %c2_i32_13 dim 1 : vector<2x256xf32>, i32 -> vector<2x256xf32>
    %cst_14 = arith.constant 1.000000e+00 : f32
    %62 = vector.shape_cast %25 : vector<1x256xi1> to vector<1x256xi1>
    %63 = vector.broadcast %62 : vector<1x256xi1> to vector<2x256xi1>
    %64 = vector.broadcast %cst_14 : f32 to vector<2x256xf32>
    %65 = arith.select %63, %61, %64 : vector<2x256xi1>, vector<2x256xf32>
    %66 = arith.minimumf %60, %65 : vector<2x256xf32>
    %67 = arith.minimumf %55, %66 : vector<2x256xf32>
    %c252_i32 = arith.constant 252 : i32
    %68 = tpu.dynamic_rotate %67 by %c252_i32 dim 1 : vector<2x256xf32>, i32 -> vector<2x256xf32>
    %cst_15 = arith.constant 1.000000e+00 : f32
    %69 = vector.shape_cast %31 : vector<1x256xi1> to vector<1x256xi1>
    %70 = vector.broadcast %69 : vector<1x256xi1> to vector<2x256xi1>
    %71 = vector.broadcast %cst_15 : f32 to vector<2x256xf32>
    %72 = arith.select %70, %68, %71 : vector<2x256xi1>, vector<2x256xf32>
    %c4_i32_16 = arith.constant 4 : i32
    %73 = tpu.dynamic_rotate %67 by %c4_i32_16 dim 1 : vector<2x256xf32>, i32 -> vector<2x256xf32>
    %cst_17 = arith.constant 1.000000e+00 : f32
    %74 = vector.shape_cast %29 : vector<1x256xi1> to vector<1x256xi1>
    %75 = vector.broadcast %74 : vector<1x256xi1> to vector<2x256xi1>
    %76 = vector.broadcast %cst_17 : f32 to vector<2x256xf32>
    %77 = arith.select %75, %73, %76 : vector<2x256xi1>, vector<2x256xf32>
    %78 = arith.minimumf %72, %77 : vector<2x256xf32>
    %79 = arith.minimumf %67, %78 : vector<2x256xf32>
    %c240_i32_18 = arith.constant 240 : i32
    %80 = tpu.dynamic_rotate %55 by %c240_i32_18 dim 1 : vector<2x256xf32>, i32 -> vector<2x256xf32>
    %cst_19 = arith.constant 1.000000e+00 : f32
    %81 = vector.shape_cast %35 : vector<1x256xi1> to vector<1x256xi1>
    %82 = vector.broadcast %81 : vector<1x256xi1> to vector<2x256xi1>
    %83 = vector.broadcast %cst_19 : f32 to vector<2x256xf32>
    %84 = arith.select %82, %80, %83 : vector<2x256xi1>, vector<2x256xf32>
    %c16_i32_20 = arith.constant 16 : i32
    %85 = tpu.dynamic_rotate %55 by %c16_i32_20 dim 1 : vector<2x256xf32>, i32 -> vector<2x256xf32>
    %cst_21 = arith.constant 1.000000e+00 : f32
    %86 = vector.shape_cast %33 : vector<1x256xi1> to vector<1x256xi1>
    %87 = vector.broadcast %86 : vector<1x256xi1> to vector<2x256xi1>
    %88 = vector.broadcast %cst_21 : f32 to vector<2x256xf32>
    %89 = arith.select %87, %85, %88 : vector<2x256xi1>, vector<2x256xf32>
    %90 = arith.minimumf %84, %89 : vector<2x256xf32>
    %91 = arith.minimumf %55, %90 : vector<2x256xf32>
    %c240_i32_22 = arith.constant 240 : i32
    %92 = tpu.dynamic_rotate %79 by %c240_i32_22 dim 1 : vector<2x256xf32>, i32 -> vector<2x256xf32>
    %cst_23 = arith.constant 1.000000e+00 : f32
    %93 = vector.shape_cast %35 : vector<1x256xi1> to vector<1x256xi1>
    %94 = vector.broadcast %93 : vector<1x256xi1> to vector<2x256xi1>
    %95 = vector.broadcast %cst_23 : f32 to vector<2x256xf32>
    %96 = arith.select %94, %92, %95 : vector<2x256xi1>, vector<2x256xf32>
    %c16_i32_24 = arith.constant 16 : i32
    %97 = tpu.dynamic_rotate %79 by %c16_i32_24 dim 1 : vector<2x256xf32>, i32 -> vector<2x256xf32>
    %cst_25 = arith.constant 1.000000e+00 : f32
    %98 = vector.shape_cast %33 : vector<1x256xi1> to vector<1x256xi1>
    %99 = vector.broadcast %98 : vector<1x256xi1> to vector<2x256xi1>
    %100 = vector.broadcast %cst_25 : f32 to vector<2x256xf32>
    %101 = arith.select %99, %97, %100 : vector<2x256xi1>, vector<2x256xf32>
    %102 = arith.minimumf %96, %101 : vector<2x256xf32>
    %103 = arith.minimumf %79, %102 : vector<2x256xf32>
    %c224_i32_26 = arith.constant 224 : i32
    %104 = tpu.dynamic_rotate %103 by %c224_i32_26 dim 1 : vector<2x256xf32>, i32 -> vector<2x256xf32>
    %cst_27 = arith.constant 1.000000e+00 : f32
    %105 = vector.shape_cast %39 : vector<1x256xi1> to vector<1x256xi1>
    %106 = vector.broadcast %105 : vector<1x256xi1> to vector<2x256xi1>
    %107 = vector.broadcast %cst_27 : f32 to vector<2x256xf32>
    %108 = arith.select %106, %104, %107 : vector<2x256xi1>, vector<2x256xf32>
    %c32_i32_28 = arith.constant 32 : i32
    %109 = tpu.dynamic_rotate %103 by %c32_i32_28 dim 1 : vector<2x256xf32>, i32 -> vector<2x256xf32>
    %cst_29 = arith.constant 1.000000e+00 : f32
    %110 = vector.shape_cast %37 : vector<1x256xi1> to vector<1x256xi1>
    %111 = vector.broadcast %110 : vector<1x256xi1> to vector<2x256xi1>
    %112 = vector.broadcast %cst_29 : f32 to vector<2x256xf32>
    %113 = arith.select %111, %109, %112 : vector<2x256xi1>, vector<2x256xf32>
    %114 = arith.minimumf %108, %113 : vector<2x256xf32>
    %115 = arith.minimumf %103, %114 : vector<2x256xf32>
    %c192_i32_30 = arith.constant 192 : i32
    %116 = tpu.dynamic_rotate %115 by %c192_i32_30 dim 1 : vector<2x256xf32>, i32 -> vector<2x256xf32>
    %cst_31 = arith.constant 1.000000e+00 : f32
    %117 = vector.shape_cast %43 : vector<1x256xi1> to vector<1x256xi1>
    %118 = vector.broadcast %117 : vector<1x256xi1> to vector<2x256xi1>
    %119 = vector.broadcast %cst_31 : f32 to vector<2x256xf32>
    %120 = arith.select %118, %116, %119 : vector<2x256xi1>, vector<2x256xf32>
    %c64_i32_32 = arith.constant 64 : i32
    %121 = tpu.dynamic_rotate %115 by %c64_i32_32 dim 1 : vector<2x256xf32>, i32 -> vector<2x256xf32>
    %cst_33 = arith.constant 1.000000e+00 : f32
    %122 = vector.shape_cast %41 : vector<1x256xi1> to vector<1x256xi1>
    %123 = vector.broadcast %122 : vector<1x256xi1> to vector<2x256xi1>
    %124 = vector.broadcast %cst_33 : f32 to vector<2x256xf32>
    %125 = arith.select %123, %121, %124 : vector<2x256xi1>, vector<2x256xf32>
    %126 = arith.minimumf %120, %125 : vector<2x256xf32>
    %127 = arith.minimumf %115, %126 : vector<2x256xf32>
    %128 = vector.extract_strided_slice %91 {offsets = [0, 0], sizes = [1, 256], strides = [1, 1]} : vector<2x256xf32> to vector<1x256xf32>
    %cst_34 = arith.constant 1.000000e+00 : f32
    %129 = vector.broadcast %cst_34 : f32 to vector<1x256xf32>
    %130 = arith.subf %129, %128 : vector<1x256xf32>
    %131 = vector.extract_strided_slice %0 {offsets = [0, 0], sizes = [3, 256], strides = [1, 1]} : vector<6x256xf32> to vector<3x256xf32>
    %132 = vector.broadcast %130 : vector<1x256xf32> to vector<3x256xf32>
    %133 = arith.mulf %131, %132 : vector<3x256xf32>
    %134 = vector.extract_strided_slice %1 {offsets = [0, 0], sizes = [3, 256], strides = [1, 1]} : vector<6x256xf32> to vector<3x256xf32>
    %135 = vector.extract_strided_slice %91 {offsets = [1, 0], sizes = [1, 256], strides = [1, 1]} : vector<2x256xf32> to vector<1x256xf32>
    %cst_35 = arith.constant 1.000000e+00 : f32
    %136 = vector.broadcast %cst_35 : f32 to vector<1x256xf32>
    %137 = arith.subf %136, %135 : vector<1x256xf32>
    %138 = vector.extract_strided_slice %0 {offsets = [3, 0], sizes = [3, 256], strides = [1, 1]} : vector<6x256xf32> to vector<3x256xf32>
    %139 = vector.broadcast %137 : vector<1x256xf32> to vector<3x256xf32>
    %140 = arith.mulf %138, %139 : vector<3x256xf32>
    %141 = vector.extract_strided_slice %1 {offsets = [3, 0], sizes = [3, 256], strides = [1, 1]} : vector<6x256xf32> to vector<3x256xf32>
    %142 = vector.extract_strided_slice %127 {offsets = [0, 0], sizes = [1, 256], strides = [1, 1]} : vector<2x256xf32> to vector<1x256xf32>
    %143 = vector.extract_strided_slice %0 {offsets = [0, 0], sizes = [3, 256], strides = [1, 1]} : vector<6x256xf32> to vector<3x256xf32>
    %144 = vector.broadcast %142 : vector<1x256xf32> to vector<3x256xf32>
    %145 = arith.mulf %143, %144 : vector<3x256xf32>
    %146 = vector.extract_strided_slice %127 {offsets = [1, 0], sizes = [1, 256], strides = [1, 1]} : vector<2x256xf32> to vector<1x256xf32>
    %147 = vector.extract_strided_slice %0 {offsets = [3, 0], sizes = [3, 256], strides = [1, 1]} : vector<6x256xf32> to vector<3x256xf32>
    %148 = vector.broadcast %146 : vector<1x256xf32> to vector<3x256xf32>
    %149 = arith.mulf %147, %148 : vector<3x256xf32>
    %150 = tpu.concatenate %91, %127, %133, %134, %140, %141, %145, %142, %149, %146 in 0 : vector<2x256xf32>, vector<2x256xf32>, vector<3x256xf32>, vector<3x256xf32>, vector<3x256xf32>, vector<3x256xf32>, vector<3x256xf32>, vector<1x256xf32>, vector<3x256xf32>, vector<1x256xf32> -> vector<24x256xf32>
    %c0_36 = arith.constant 0 : index
    %c0_37 = arith.constant 0 : index
    %151 = vector.load %arg4[%c0_36, %c0_37] : memref<24x256xf32, #tpu.memory_space<vmem>>, vector<24x256xf32>
    tpu.vector_store %arg4[%c0_36, %c0_37], %150 {strides = array<i32>} : memref<24x256xf32, #tpu.memory_space<vmem>>, vector<24x256xf32>,
    %c0_38 = arith.constant 0 : index
    %c0_39 = arith.constant 0 : index
    %c0_40 = arith.constant 0 : index
    %152 = vector.load %arg3[%c0_38, %c0_39, %c0_40] : memref<2x2x19xf32, #tpu.memory_space<vmem>>, vector<2x2x19xf32>
    %153 = vector.extract_strided_slice %152 {offsets = [0, 0, 0], sizes = [1, 2, 19], strides = [1, 1, 1]} : vector<2x2x19xf32> to vector<1x2x19xf32>
    %154 = vector.shape_cast %153 : vector<1x2x19xf32> to vector<2x19xf32>
    %cst_41 = arith.constant 1.000000e+00 : f32
    %155 = vector.broadcast %cst_41 : f32 to vector<2x19xf32>
    %156 = arith.addf %154, %155 : vector<2x19xf32>
    %cst_42 = arith.constant 5.000000e-01 : f32
    %157 = vector.broadcast %cst_42 : f32 to vector<2x19xf32>
    %158 = arith.mulf %156, %157 : vector<2x19xf32>
    %159 = vector.extract_strided_slice %152 {offsets = [1, 0, 0], sizes = [1, 2, 19], strides = [1, 1, 1]} : vector<2x2x19xf32> to vector<1x2x19xf32>
    %160 = vector.shape_cast %159 : vector<1x2x19xf32> to vector<2x19xf32>
    %cst_43 = arith.constant 1.000000e+00 : f32
    %161 = vector.broadcast %cst_43 : f32 to vector<2x19xf32>
    %162 = arith.addf %160, %161 : vector<2x19xf32>
    %cst_44 = arith.constant 5.000000e-01 : f32
    %163 = vector.broadcast %cst_44 : f32 to vector<2x19xf32>
    %164 = arith.mulf %162, %163 : vector<2x19xf32>
    %165 = vector.extract_strided_slice %158 {offsets = [0, 12], sizes = [2, 7], strides = [1, 1]} : vector<2x19xf32> to vector<2x7xf32>
    %166 = vector.extract_strided_slice %164 {offsets = [0, 12], sizes = [2, 7], strides = [1, 1]} : vector<2x19xf32> to vector<2x7xf32>
    %cst_45 = arith.constant 5.000000e-02 : f32
    %167 = vector.broadcast %cst_45 : f32 to vector<2x7xf32>
    %168 = arith.subf %165, %167 : vector<2x7xf32>
    %cst_46 = arith.constant dense<0x7F800000> : vector<2xf32>
    %169 = vector.multi_reduction <minimumf>, %168, %cst_46 [1] : vector<2x7xf32> to vector<2xf32>
    %170 = vector.shape_cast %169 : vector<2xf32> to vector<2x1xf32>
    %cst_47 = arith.constant 0.000000e+00 : f32
    %171 = vector.broadcast %cst_47 : f32 to vector<2x1xf32>
    %172 = arith.maximumf %170, %171 : vector<2x1xf32>
    %cst_48 = arith.constant 5.000000e-02 : f32
    %173 = vector.broadcast %cst_48 : f32 to vector<2x7xf32>
    %174 = arith.addf %165, %173 : vector<2x7xf32>
    %cst_49 = arith.constant dense<0xFF800000> : vector<2xf32>
    %175 = vector.multi_reduction <maximumf>, %174, %cst_49 [1] : vector<2x7xf32> to vector<2xf32>
    %176 = vector.shape_cast %175 : vector<2xf32> to vector<2x1xf32>
    %cst_50 = arith.constant 1.000000e+00 : f32
    %177 = vector.broadcast %cst_50 : f32 to vector<2x1xf32>
    %178 = arith.minimumf %176, %177 : vector<2x1xf32>
    %cst_51 = arith.constant 5.000000e-02 : f32
    %179 = vector.broadcast %cst_51 : f32 to vector<2x7xf32>
    %180 = arith.subf %166, %179 : vector<2x7xf32>
    %cst_52 = arith.constant dense<0x7F800000> : vector<2xf32>
    %181 = vector.multi_reduction <minimumf>, %180, %cst_52 [1] : vector<2x7xf32> to vector<2xf32>
    %182 = vector.shape_cast %181 : vector<2xf32> to vector<2x1xf32>
    %cst_53 = arith.constant 0.000000e+00 : f32
    %183 = vector.broadcast %cst_53 : f32 to vector<2x1xf32>
    %184 = arith.maximumf %182, %183 : vector<2x1xf32>
    %cst_54 = arith.constant dense<0xFF800000> : vector<2xf32>
    %185 = vector.multi_reduction <maximumf>, %166, %cst_54 [1] : vector<2x7xf32> to vector<2xf32>
    %186 = vector.shape_cast %185 : vector<2xf32> to vector<2x1xf32>
    %cst_55 = arith.constant 1.000000e+00 : f32
    %187 = vector.broadcast %cst_55 : f32 to vector<2x1xf32>
    %188 = arith.minimumf %186, %187 : vector<2x1xf32>
    %cst_56 = arith.constant dense<0x7F800000> : vector<2xf32>
    %189 = vector.multi_reduction <minimumf>, %158, %cst_56 [1] : vector<2x19xf32> to vector<2xf32>
    %190 = vector.shape_cast %189 : vector<2xf32> to vector<2x1xf32>
    %cst_57 = arith.constant dense<0xFF800000> : vector<2xf32>
    %191 = vector.multi_reduction <maximumf>, %158, %cst_57 [1] : vector<2x19xf32> to vector<2xf32>
    %192 = vector.shape_cast %191 : vector<2xf32> to vector<2x1xf32>
    %193 = arith.addf %190, %192 : vector<2x1xf32>
    %cst_58 = arith.constant 5.000000e-01 : f32
    %194 = vector.broadcast %cst_58 : f32 to vector<2x1xf32>
    %195 = arith.mulf %193, %194 : vector<2x1xf32>
    %196 = arith.subf %192, %190 : vector<2x1xf32>
    %cst_59 = arith.constant 1.200000e+00 : f32
    %197 = vector.broadcast %cst_59 : f32 to vector<2x1xf32>
    %198 = arith.mulf %196, %197 : vector<2x1xf32>
    %cst_60 = arith.constant 5.000000e-01 : f32
    %199 = vector.broadcast %cst_60 : f32 to vector<2x1xf32>
    %200 = arith.mulf %198, %199 : vector<2x1xf32>
    %201 = arith.subf %195, %200 : vector<2x1xf32>
    %cst_61 = arith.constant 0.000000e+00 : f32
    %202 = vector.broadcast %cst_61 : f32 to vector<2x1xf32>
    %203 = arith.maximumf %202, %201 : vector<2x1xf32>
    %cst_62 = arith.constant 5.000000e-01 : f32
    %204 = vector.broadcast %cst_62 : f32 to vector<2x1xf32>
    %205 = arith.mulf %198, %204 : vector<2x1xf32>
    %206 = arith.addf %195, %205 : vector<2x1xf32>
    %cst_63 = arith.constant 1.000000e+00 : f32
    %207 = vector.broadcast %cst_63 : f32 to vector<2x1xf32>
    %208 = arith.minimumf %207, %206 : vector<2x1xf32>
    %cst_64 = arith.constant dense<0x7F800000> : vector<2xf32>
    %209 = vector.multi_reduction <minimumf>, %164, %cst_64 [1] : vector<2x19xf32> to vector<2xf32>
    %210 = vector.shape_cast %209 : vector<2xf32> to vector<2x1xf32>
    %cst_65 = arith.constant dense<0xFF800000> : vector<2xf32>
    %211 = vector.multi_reduction <maximumf>, %164, %cst_65 [1] : vector<2x19xf32> to vector<2xf32>
    %212 = vector.shape_cast %211 : vector<2xf32> to vector<2x1xf32>
    %213 = arith.addf %210, %212 : vector<2x1xf32>
    %cst_66 = arith.constant 5.000000e-01 : f32
    %214 = vector.broadcast %cst_66 : f32 to vector<2x1xf32>
    %215 = arith.mulf %213, %214 : vector<2x1xf32>
    %216 = arith.subf %212, %210 : vector<2x1xf32>
    %cst_67 = arith.constant 1.200000e+00 : f32
    %217 = vector.broadcast %cst_67 : f32 to vector<2x1xf32>
    %218 = arith.mulf %216, %217 : vector<2x1xf32>
    %cst_68 = arith.constant 5.000000e-01 : f32
    %219 = vector.broadcast %cst_68 : f32 to vector<2x1xf32>
    %220 = arith.mulf %218, %219 : vector<2x1xf32>
    %221 = arith.subf %215, %220 : vector<2x1xf32>
    %cst_69 = arith.constant 0.000000e+00 : f32
    %222 = vector.broadcast %cst_69 : f32 to vector<2x1xf32>
    %223 = arith.maximumf %222, %221 : vector<2x1xf32>
    %cst_70 = arith.constant 5.000000e-01 : f32
    %224 = vector.broadcast %cst_70 : f32 to vector<2x1xf32>
    %225 = arith.mulf %218, %224 : vector<2x1xf32>
    %226 = arith.addf %215, %225 : vector<2x1xf32>
    %cst_71 = arith.constant 1.000000e+00 : f32
    %227 = vector.broadcast %cst_71 : f32 to vector<2x1xf32>
    %228 = arith.minimumf %227, %226 : vector<2x1xf32>
    %229 = tpu.concatenate %172, %178, %184, %188, %203, %208, %223, %228 in 1 : vector<2x1xf32>, vector<2x1xf32>, vector<2x1xf32>, vector<2x1xf32>, vector<2x1xf32>, vector<2x1xf32>, vector<2x1xf32>, vector<2x1xf32> -> vector<2x8xf32>
    %cst_72 = arith.constant 1.600000e+01 : f32
    %230 = vector.broadcast %cst_72 : f32 to vector<2x8xf32>
    %231 = arith.mulf %229, %230 : vector<2x8xf32>
    %232 = arith.fptosi %231 : vector<2x8xf32> to vector<2x8xi32>
    %c0_73 = arith.constant 0 : index
    %c0_74 = arith.constant 0 : index
    %233 = vector.load %arg5[%c0_73, %c0_74] : memref<2x8xi32, #tpu.memory_space<vmem>>, vector<2x8xi32>
    tpu.vector_store %arg5[%c0_73, %c0_74], %232 {strides = array<i32>} : memref<2x8xi32, #tpu.memory_space<vmem>>, vector<2x8xi32>,
    return
  }
}

</mosaic_0001>

<bundles_post_ra>
// kernel: squeeze.1
= control target key start
LH: loop header
LB: loop body
LE: loop exit
PB: predicated region body
PF: predicated region fallthrough
CT: control target
= control target key end

     0   :  { %s8_s6 = smov 3  ;;  %s11_s7 = smov 12  ;;  %vm13_vm0 = vcmask 1043458   ;;  %vm3_vm1 = vcmask 130048   ;;  %vm17_vm2 = vcmask 1048448   ;;  %vm31_vm3 = vcmask 917248   ;;  %s213_s0 = inlined_call_operand.vmem [shape: f32[2,1,16,16], index: 0, kind: input, shape index: {}]   ;;  %s214_s1 = inlined_call_operand.vmem [shape: f32[2,256], index: 1, kind: output, shape index: {}]  }
   0x1   :  { %v116_v0 = vld [vmem:[%s213_s0 + $0x7] ss:$16 sm:%s8_s6]   ;;  %v117_v1 = vld [vmem:[%s213_s0 - $0x11] ss:$16 sm:%s11_s7]   ;;  %s36_s12 = smov 3  ;;  %s39_s15 = smov 12 }
   0x2   :  { %v14_v2 = vsel %vm13_vm0, %v117_v1, %v116_v0  ;;  %v120_v3 = vld [vmem:[%s213_s0 + $0x5] ss:$16 sm:%s36_s12]   ;;  %s138_s16 = smov 112   ;;  %v121_v4 = vld [vmem:[%s213_s0 - $0x13] ss:$16 sm:%s39_s15]   ;;  %s22_s19 = smov 3 }
   0x3   :  { %15 = vrot.lane.b32.xlu0 %v14_v2, %s138_s16  ;;  %s25_s20 = smov 12  ;;  %v42_v5 = vsel %vm13_vm0, %v121_v4, %v120_v3  ;;  %v118_v6 = vld [vmem:[%s213_s0 + $0x6] ss:$16 sm:%s22_s19]   ;;  %s50_s25 = smov 3  ;;  %vm45_vm4 = vcmask 786048   ;;  %vm59_vm5 = vcmask 654848  }
   0x4   :  { %v119_v7 = vld [vmem:[%s213_s0 - $0x12] ss:$16 sm:%s25_s20]   ;;  %s139_s26 = smov 80   ;;  %v122_v9 = vld [vmem:[%s213_s0 + $0x4] ss:$16 sm:%s50_s25]   ;;  %s53_s29 = smov 12 }
   0x5   :  { %43 = vrot.lane.b32.xlu1 %v42_v5, %s139_s26  ;;  %v28_v8 = vsel %vm13_vm0, %v119_v7, %v118_v6  ;;  %v123_v10 = vld [vmem:[%s213_s0 - $0x14] ss:$16 sm:%s53_s29]   ;;  %s64_s3 = smov 3  ;;  %s67_s4 = smov 12  ;;  %vm73_vm6 = vcmask 523648   ;;  %vm87_vm7 = vcmask 392448  }
   0x6   :  { %s140_s5 = smov 96   ;;  %v56_v11 = vsel %vm13_vm0, %v123_v10, %v122_v9  ;;  %v124_v12 = vld [vmem:[%s213_s0 + $0x3] ss:$16 sm:%s64_s3]   ;;  %s78_s8 = smov 3  ;;  %v125_v13 = vld [vmem:[%s213_s0 - $0x15] ss:$16 sm:%s67_s4]  }
   0x7   :  { %29 = vrot.lane.b32.xlu0 %v28_v8, %s140_s5  ;;  %v126_v14 = vld [vmem:[%s213_s0 + $0x2] ss:$16 sm:%s78_s8]   ;;  %s81_s13 = smov 12  ;;  %s141_s14 = smov 64   ;;  %v70_v15 = vsel %vm13_vm0, %v125_v13, %v124_v12  ;;  %vm101_vm8 = vcmask 261248  }
   0x8   :  { %v127_v16 = vld [vmem:[%s213_s0 - $0x16] ss:$16 sm:%s81_s13]   ;;  %s92_s17 = smov 3  ;;  %s95_s18 = smov 12 }
   0x9   :  { %57 = vrot.lane.b32.xlu1 %v56_v11, %s141_s14  ;;  %v84_v17 = vsel %vm13_vm0, %v127_v16, %v126_v14  ;;  %v128_v18 = vld [vmem:[%s213_s0 + $0x1] ss:$16 sm:%s92_s17]   ;;  %s142_s23 = smov 48   ;;  %v2_v20 = vld [vmem:[%s213_s0] ss:$8 sm:$0xf]  }
   0xa   :  { %v129_v19 = vld [vmem:[%s213_s0 - $0x17] ss:$16 sm:%s95_s18]   ;;  %4 = vst.msk [vmem:[#allocation0] ss:$8 sm:$0x3] %vm3_vm1, %v2_v20   ;;  %s143_s0 = smov 32  }
   0xb   :  { %71 = vrot.lane.b32.xlu0 %v70_v15, %s142_s23  ;;  %v98_v21 = vsel %vm13_vm0, %v129_v19, %v128_v18  ;;  %6 = vst.msk [vmem:[#allocation0 - $0xf] ss:$8 sm:$0xc] %vm3_vm1, %v2_v20   ;;  %s144_s26 = smov 16  }
   0xd   :  { %85 = vrot.lane.b32.xlu1 %v84_v17, %s143_s0 }
   0xf   :  { %99 = vrot.lane.b32.xlu0 %v98_v21, %s144_s26 }
  0x75   :  { %v16_v22 = vpop.permute.xlu0 %15  }
  0x76   :  { %18 = vst.msk [vmem:[#allocation0] sm:$0x3] %vm17_vm2, %v16_v22   ;;  %20 = vst.msk [vmem:[#allocation0 + $0x6] sm:$0xc] %vm17_vm2, %v16_v22  }
  0x77   :  { %v44_v23 = vpop.permute.xlu1 %43  }
  0x79   :  { %v30_v24 = vpop.permute.xlu0 %29  }
  0x7a   :  { %32 = vst.msk [vmem:[#allocation0] sm:$0x3] %vm31_vm3, %v30_v24   ;;  %34 = vst.msk [vmem:[#allocation0 + $0x6] sm:$0xc] %vm31_vm3, %v30_v24  }
  0x7b   :  { %46 = vst.msk [vmem:[#allocation0] sm:$0x3] %vm45_vm4, %v44_v23   ;;  %48 = vst.msk [vmem:[#allocation0 + $0x6] sm:$0xc] %vm45_vm4, %v44_v23   ;;  %v58_v25 = vpop.permute.xlu1 %57  }
  0x7c   :  { %60 = vst.msk [vmem:[#allocation0] sm:$0x3] %vm59_vm5, %v58_v25   ;;  %62 = vst.msk [vmem:[#allocation0 + $0x6] sm:$0xc] %vm59_vm5, %v58_v25  }
  0x7d   :  { %v72_v26 = vpop.permute.xlu0 %71  }
  0x7e   :  { %74 = vst.msk [vmem:[#allocation0] sm:$0x3] %vm73_vm6, %v72_v26   ;;  %76 = vst.msk [vmem:[#allocation0 + $0x6] sm:$0xc] %vm73_vm6, %v72_v26  }
  0x7f   :  { %v86_v27 = vpop.permute.xlu1 %85  }
  0x80   :  { %88 = vst.msk [vmem:[#allocation0] sm:$0x3] %vm87_vm7, %v86_v27   ;;  %90 = vst.msk [vmem:[#allocation0 + $0x6] sm:$0xc] %vm87_vm7, %v86_v27  }
  0x81   :  { %v100_v28 = vpop.permute.xlu0 %99  }
  0x82   :  { %102 = vst.msk [vmem:[#allocation0] sm:$0x3] %vm101_vm8, %v100_v28   ;;  %104 = vst.msk [vmem:[#allocation0 + $0x6] sm:$0xc] %vm101_vm8, %v100_v28  }
  0x89   :  { %v108_v29 = vld [vmem:[#allocation0] sm:$0x3]  ;;  %v112_v30 = vld [vmem:[#allocation0 + $0x8] sm:$0x3] }
  0x8a   :  { %110 = vst [vmem:[%s214_s1] sm:$0x3] %v108_v29  ;;  %130 = vst [vmem:[%s214_s1 + $0x2] sm:$0x3] %v112_v30 }

// kernel: body_recovery_flow.1
= control target key start
LH: loop header
LB: loop body
LE: loop exit
PB: predicated region body
PF: predicated region fallthrough
CT: control target
= control target key end

     0   :  { %v24_v0 = vlaneseq  ;;  %v663_v1 = vmov 1983009808   ;;  %s664_s20 = smov 1   ;;  %s665_s21 = smov 127   ;;  %s910_s2 = inlined_call_operand.vmem [shape: f32[2,256], index: 2, kind: input, shape index: {}]   ;;  %s911_s3 = inlined_call_operand.vmem [shape: f32[2,2,19], index: 3, kind: input, shape index: {}]   ;;  %s912_s5 = inlined_call_operand.vmem [shape: s32[2,8], index: 5, kind: output, shape index: {1}]   ;;  %s913_s0 = inlined_call_operand.vmem [shape: f32[6,256], index: 0, kind: input, shape index: {}]   ;;  %s914_s1 = inlined_call_operand.vmem [shape: f32[6,256], index: 1, kind: input, shape index: {}]   ;;  %s915_s4 = inlined_call_operand.vmem [shape: f32[24,256], index: 4, kind: output, shape index: {0}]  }
   0x1   :  { %v77_v2 = vunpack.c.l.s4 %v663_v1  ;;  %v23_v5 = vld [vmem:[%s910_s2] sm:$0xf]  ;;  %s666_s2 = smov 126   ;;  %s667_s22 = smov 2  }
   0x2   :  { %v705_v3 = vshrl.u32 %v24_v0, 7  ;;  %v714_v9 = vand.u32 127, %v24_v0  ;;  %s668_s23 = smov 124   ;;  %s669_s24 = smov 4  }
   0x3   :  { %v78_v4 = vunpack.c.0.s8 %v77_v2  ;;  %s670_s25 = smov 112   ;;  %s671_s26 = smov 16  }
   0x4   :  { %v717_v10 = vadd.s32 128, %v714_v9  ;;  %v720_v11 = vand.u32 15, %v714_v9  ;;  %vm103_vm0 = vcmp.lt.s32.totalorder %v714_v9, 1  ;;  %vm90_vm1 = vcmp.lt.s32.totalorder %v714_v9, 127  ;;  %s672_s27 = smov 96   ;;  %s673_s28 = smov 32  }
   0x5   :  { %v711_v6 = vsub.s32 %v78_v4, %v705_v3  ;;  %vm141_vm6 = vcmp.lt.s32.totalorder %v714_v9, 126  ;;  %vm154_vm9 = vcmp.lt.s32.totalorder %v714_v9, 2  ;;  %vm192_vm12 = vcmp.lt.s32.totalorder %v714_v9, 124 }
   0x6   :  { %v723_v12 = vand.u32 15, %v717_v10  ;;  %vm51_vm2 = vcmp.ge.s32.totalorder %v720_v11, 1  ;;  %vm53_vm4 = vcmp.lt.s32.totalorder %v720_v11, 15  ;;  %vm57_vm7 = vcmp.lt.s32.totalorder %v720_v11, 14 }
   0x7   :  { %v82_v7 = vrot.slane %v23_v5, %v711_v6  ;;  %vm55_vm10 = vcmp.ge.s32.totalorder %v720_v11, 2  ;;  %vm61_vm13 = vcmp.lt.s32.totalorder %v720_v11, 12  ;;  %vm205_vm15 = vcmp.lt.s32.totalorder %v714_v9, 4 }
   0x8   :  { %vm52_vm3 = vcmp.ge.s32.totalorder %v723_v12, 1  ;;  %vm54_vm5 = vcmp.lt.s32.totalorder %v723_v12, 15  ;;  %vm58_vm8 = vcmp.lt.s32.totalorder %v723_v12, 14  ;;  %vm56_vm11 = vcmp.ge.s32.totalorder %v723_v12, 2 }
   0x9   :  { %99 = vrot.lane.b32.xlu1 %v82_v7, %s664_s20  ;;  %86 = vrot.lane.b32.xlu0 %v82_v7, %s665_s21  ;;  %v83_v8 = vcombine.high %v82_v7, %v82_v7  ;;  %vm62_vm14 = vcmp.lt.s32.totalorder %v723_v12, 12 }
   0xd   :  { %101 = vrot.lane.b32.xlu1 %v83_v8, %s664_s20  ;;  %88 = vrot.lane.b32.xlu0 %v83_v8, %s665_s21 }
  0x7b   :  { %v100_v13 = vpop.permute.xlu1 %99  ;;  %v87_v14 = vpop.permute.xlu0 %86 }
  0x7f   :  { %v102_v15 = vpop.permute.xlu1 %101  ;;  %v89_v16 = vpop.permute.xlu0 %88 }
  0x80   :  { %v104_v17 = vsel %vm103_vm0, %v100_v13, %v102_v15  ;;  %v105_v18 = vsel %vm103_vm0, %v102_v15, %v100_v13  ;;  %v91_v19 = vsel %vm90_vm1, %v87_v14, %v89_v16  ;;  %v92_v20 = vsel %vm90_vm1, %v89_v16, %v87_v14 }
  0x81   :  { %v110_v21 = vsel %vm51_vm2, %v105_v18, 1.0  ;;  %v111_v22 = vsel %vm52_vm3, %v104_v17, 1.0  ;;  %v97_v23 = vsel %vm53_vm4, %v91_v19, 1.0  ;;  %v98_v24 = vsel %vm54_vm5, %v92_v20, 1.0 }
  0x82   :  { %v112_v25 = vmin.f32 %v97_v23, %v110_v21  ;;  %v113_v26 = vmin.f32 %v98_v24, %v111_v22  ;;  %vm59_vm0 = vcmp.ge.s32.totalorder %v720_v11, 4  ;;  %vm60_vm1 = vcmp.ge.s32.totalorder %v723_v12, 4 }
  0x83   :  { %vm232_vm2 = vcmp.lt.s32.totalorder %v714_v9, 112  ;;  %vm66_vm3 = vcmp.lt.s32.totalorder %v717_v10, 240  ;;  %vm245_vm4 = vcmp.lt.s32.totalorder %v714_v9, 16  ;;  %vm63_vm5 = vcmp.ge.s32.totalorder %v714_v9, 16 }
  0x84   :  { %v116_v27 = vcombine.low %v112_v25, %v113_v26 }
  0x86   :  { %v123_v28 = vrot.slane %v116_v27, %v711_v6  ;;  %v564_v27 = vld [vmem:[%s911_s3] sm:$0x3] }
  0x88   :  { %v732_v29 = vmin.f32 %v23_v5, %v123_v28  ;;  %v566_v28 = vadd.f32 1.0, %v564_v27 }
  0x8a   :  { %v736_v30 = vrot.slane %v732_v29, %v711_v6 }
  0x8c   :  { %137 = vrot.lane.b32.xlu0 %v736_v30, %s666_s2  ;;  %v741_v31 = vcombine.high %v736_v30, %v736_v30 }
  0x8e   :  { %139 = vrot.lane.b32.xlu1 %v741_v31, %s666_s2 }
  0x90   :  { %150 = vrot.lane.b32.xlu0 %v736_v30, %s667_s22 }
  0x92   :  { %152 = vrot.lane.b32.xlu1 %v741_v31, %s667_s22 }
  0xfe   :  { %v138_v32 = vpop.permute.xlu0 %137 }
 0x100   :  { %v140_v33 = vpop.permute.xlu1 %139 }
 0x101   :  { %v142_v34 = vsel %vm141_vm6, %v138_v32, %v140_v33  ;;  %v143_v35 = vsel %vm141_vm6, %v140_v33, %v138_v32  ;;  %v565_v32 = vld [vmem:[%s911_s3 + $0x2] sm:$0x3]  ;;  %v567_v33 = vmul.f32 0.5, %v566_v28  ;;  %vm590_vm6 = vcmask 148480   ;;  %s674_s3 = smov 64  }
 0x102   :  { %v151_v36 = vpop.permute.xlu0 %150  ;;  %v148_v40 = vsel %vm57_vm7, %v142_v34, 1.0  ;;  %v149_v41 = vsel %vm58_vm8, %v143_v35, 1.0  ;;  %v568_v34 = vadd.f32 1.0, %v565_v32  ;;  %vm571_vm7 = vcmask 148576  }
 0x103   :  { %v591_v35 = vsel %vm590_vm6, %v567_v33, inf  ;;  %vm324_vm8 = vcmp.lt.s32.totalorder %v714_v9, 96 }
 0x104   :  { %v153_v37 = vpop.permute.xlu1 %152 }
 0x105   :  { %v155_v38 = vsel %vm154_vm9, %v151_v36, %v153_v37  ;;  %v156_v39 = vsel %vm154_vm9, %v153_v37, %v151_v36  ;;  %v569_v36 = vmul.f32 0.5, %v568_v34  ;;  %vm70_vm9 = vcmp.lt.s32.totalorder %v717_v10, 224 }
 0x106   :  { %v161_v42 = vsel %vm55_vm10, %v156_v39, 1.0  ;;  %v162_v43 = vsel %vm56_vm11, %v155_v38, 1.0  ;;  %v594_v38 = vsel %vm590_vm6, %v567_v33, -inf  ;;  %v647_v39 = vadd.f32 -0.05, %v567_v33 }
 0x107   :  { %v163_v44 = vmin.f32 %v148_v40, %v161_v42  ;;  %v164_v45 = vmin.f32 %v149_v41, %v162_v43  ;;  %v606_v37 = vsel %vm590_vm6, %v569_v36, inf  ;;  %v609_v40 = vsel %vm590_vm6, %v569_v36, -inf }
 0x108   :  { %v576_v41 = vadd.f32 0.05, %v567_v33  ;;  %v572_v42 = vsel %vm571_vm7, %v647_v39, inf  ;;  %v648_v43 = vadd.f32 -0.05, %v569_v36  ;;  %vm337_vm10 = vcmp.lt.s32.totalorder %v714_v9, 32 }
 0x109   :  { %v167_v46 = vcombine.low %v163_v44, %v164_v45  ;;  %vm67_vm11 = vcmp.ge.s32.totalorder %v714_v9, 32  ;;  %vm633_vm6 = vcmask 56320  }
 0x10a   :  { %v577_v44 = vsel %vm571_vm7, %v576_v41, -inf  ;;  %v582_v45 = vsel %vm571_vm7, %v648_v43, inf }
 0x10b   :  { %v174_v47 = vrot.slane %v167_v46, %v711_v6  ;;  %v586_v46 = vsel %vm571_vm7, %v569_v36, -inf  ;;  %vm637_vm7 = vcmask 58368  }
 0x10d   :  { %v176_v48 = vmin.f32 %v732_v29, %v174_v47 }
 0x10f   :  { %v184_v49 = vrot.slane %v176_v48, %v711_v6 }
 0x111   :  { %188 = vrot.lane.b32.xlu0 %v184_v49, %s668_s23  ;;  %v185_v50 = vcombine.high %v184_v49, %v184_v49 }
 0x113   :  { %190 = vrot.lane.b32.xlu1 %v185_v50, %s668_s23 }
 0x115   :  { %201 = vrot.lane.b32.xlu0 %v184_v49, %s669_s24 }
 0x117   :  { %203 = vrot.lane.b32.xlu1 %v185_v50, %s669_s24 }
 0x183   :  { %v189_v51 = vpop.permute.xlu0 %188 }
 0x185   :  { %v191_v52 = vpop.permute.xlu1 %190 }
 0x186   :  { %v193_v53 = vsel %vm192_vm12, %v189_v51, %v191_v52  ;;  %v194_v54 = vsel %vm192_vm12, %v191_v52, %v189_v51  ;;  %vm621_vm12 = vcmask 7168  }
 0x187   :  { %v202_v55 = vpop.permute.xlu0 %201  ;;  %v199_v59 = vsel %vm61_vm13, %v193_v53, 1.0  ;;  %v200_v60 = vsel %vm62_vm14, %v194_v54, 1.0  ;;  %vm623_vm13 = vcmask 15360   ;;  %vm625_vm14 = vcmask 23552  }
 0x189   :  { %v204_v56 = vpop.permute.xlu1 %203 }
 0x18a   :  { %v206_v57 = vsel %vm205_vm15, %v202_v55, %v204_v56  ;;  %v207_v58 = vsel %vm205_vm15, %v204_v56, %v202_v55  ;;  %vm627_vm15 = vcmask 31744  }
 0x18b   :  { %v212_v61 = vsel %vm59_vm0, %v207_v58, 1.0  ;;  %v213_v62 = vsel %vm60_vm1, %v206_v57, 1.0  ;;  %vm629_vm0 = vcmask 39936   ;;  %vm631_vm1 = vcmask 48128  }
 0x18c   :  { %v214_v63 = vmin.f32 %v199_v59, %v212_v61  ;;  %v215_v0 = vmin.f32 %v200_v60, %v213_v62 }
 0x18e   :  { %v218_v1 = vcombine.low %v214_v63, %v215_v0 }
 0x190   :  { %v225_v2 = vrot.slane %v218_v1, %v711_v6 }
 0x192   :  { %v227_v4 = vmin.f32 %v176_v48, %v225_v2 }
 0x194   :  { %v275_v5 = vrot.slane %v227_v4, %v711_v6 }
 0x196   :  { %279 = vrot.lane.b32.xlu0 %v275_v5, %s670_s25  ;;  %v276_v7 = vcombine.high %v275_v5, %v275_v5 }
 0x198   :  { %281 = vrot.lane.b32.xlu1 %v276_v7, %s670_s25 }
 0x19a   :  { %287 = vrot.lane.b32.xlu0 %v275_v5, %s671_s26 }
 0x19c   :  { %289 = vrot.lane.b32.xlu1 %v276_v7, %s671_s26 }
 0x208   :  { %v280_v8 = vpop.permute.xlu0 %279 }
 0x20a   :  { %v282_v11 = vpop.permute.xlu1 %281 }
 0x20b   :  { %v284_v12 = vsel %vm232_vm2, %v282_v11, %v280_v8  ;;  %v283_v18 = vsel %vm232_vm2, %v280_v8, %v282_v11 }
 0x20c   :  { %v288_v13 = vpop.permute.xlu0 %287  ;;  %v286_v15 = vsel %vm66_vm3, %v284_v12, 1.0 }
 0x20e   :  { %v290_v14 = vpop.permute.xlu1 %289 }
 0x20f   :  { %v291_v16 = vsel %vm245_vm4, %v288_v13, %v290_v14  ;;  %v292_v17 = vsel %vm245_vm4, %v290_v14, %v288_v13 }
 0x210   :  { %v293_v19 = vsel %vm63_vm5, %v292_v17, 1.0  ;;  %v296_v20 = vmin.f32 %v286_v15, %v291_v16 }
 0x211   :  { %v295_v21 = vmin.f32 %v283_v18, %v293_v19 }
 0x213   :  { %v299_v22 = vcombine.low %v295_v21, %v296_v20 }
 0x215   :  { %v306_v23 = vrot.slane %v299_v22, %v711_v6 }
 0x217   :  { %v308_v24 = vmin.f32 %v227_v4, %v306_v23 }
 0x219   :  { %v316_v25 = vrot.slane %v308_v24, %v711_v6 }
 0x21b   :  { %320 = vrot.lane.b32.xlu0 %v316_v25, %s672_s27  ;;  %v317_v26 = vcombine.high %v316_v25, %v316_v25 }
 0x21d   :  { %322 = vrot.lane.b32.xlu1 %v317_v26, %s672_s27 }
 0x21f   :  { %333 = vrot.lane.b32.xlu0 %v316_v25, %s673_s28 }
 0x221   :  { %335 = vrot.lane.b32.xlu1 %v317_v26, %s673_s28 }
 0x23e   :  { %592 = vmin.xlane.f32.xlu0 %v591_v35 }
 0x242   :  { %607 = vmin.xlane.f32.xlu0 %v606_v37 }
 0x245   :  { %595 = vmax.xlane.f32.xlu1 %v594_v38 }
 0x246   :  { %610 = vmax.xlane.f32.xlu0 %v609_v40 }
 0x249   :  { %573 = vmin.xlane.f32.xlu1 %v572_v42 }
 0x24a   :  { %578 = vmax.xlane.f32.xlu0 %v577_v44 }
 0x24d   :  { %583 = vmin.xlane.f32.xlu1 %v582_v45 }
 0x24e   :  { %587 = vmax.xlane.f32.xlu0 %v586_v46 }
 0x25e   :  { %228 = vrot.lane.b32.xlu1 %v736_v30, %s670_s25 }
 0x262   :  { %241 = vrot.lane.b32.xlu1 %v736_v30, %s671_s26 }
 0x264   :  { %230 = vrot.lane.b32.xlu0 %v741_v31, %s670_s25 }
 0x266   :  { %243 = vrot.lane.b32.xlu1 %v741_v31, %s671_s26 }
 0x28d   :  { %v321_v47 = vpop.permute.xlu0 %320 }
 0x28f   :  { %v323_v48 = vpop.permute.xlu1 %322 }
 0x290   :  { %v326_v49 = vsel %vm324_vm8, %v323_v48, %v321_v47  ;;  %v325_v54 = vsel %vm324_vm8, %v321_v47, %v323_v48  ;;  %vm74_vm8 = vcmp.lt.s32.totalorder %v717_v10, 192 }
 0x291   :  { %v334_v50 = vpop.permute.xlu0 %333  ;;  %v332_v30 = vsel %vm70_vm9, %v326_v49, 1.0  ;;  %vm540_vm9 = vcmask 1043456  }
 0x293   :  { %v336_v51 = vpop.permute.xlu1 %335 }
 0x294   :  { %v338_v52 = vsel %vm337_vm10, %v334_v50, %v336_v51  ;;  %v339_v53 = vsel %vm337_vm10, %v336_v51, %v334_v50  ;;  %vm543_vm10 = vcmask 1046528  }
 0x295   :  { %v344_v55 = vsel %vm67_vm11, %v339_v53, 1.0  ;;  %v347_v56 = vmin.f32 %v332_v30, %v338_v52  ;;  %vm551_vm11 = vcmask 1042432  }
 0x296   :  { %v346_v31 = vmin.f32 %v325_v54, %v344_v55 }
 0x298   :  { %v350_v57 = vcombine.low %v346_v31, %v347_v56 }
 0x29a   :  { %v357_v58 = vrot.slane %v350_v57, %v711_v6  ;;  %v825_v57 = vsub.s32 1, %v705_v3 }
 0x29c   :  { %v804_v59 = vmin.f32 %v308_v24, %v357_v58  ;;  %v432_v58 = vsub.s32 3, %v705_v3 }
 0x29e   :  { %v367_v60 = vrot.slane %v804_v59, %v711_v6 }
 0x2a0   :  { %371 = vrot.lane.b32.xlu0 %v367_v60, %s674_s3  ;;  %v368_v61 = vcombine.high %v367_v60, %v367_v60 }
 0x2a2   :  { %373 = vrot.lane.b32.xlu1 %v368_v61, %s674_s3 }
 0x2cb   :  { %v593_v62 = vpop.xlane.xlu0 %592 }
 0x2cf   :  { %v608_v63 = vpop.xlane.xlu0 %607 }
 0x2d2   :  { %v596_v0 = vpop.xlane.xlu1 %595 }
 0x2d3   :  { %v597_v1 = vadd.f32 %v596_v0, %v593_v62  ;;  %v599_v2 = vsub.f32 %v596_v0, %v593_v62  ;;  %v611_v4 = vpop.xlane.xlu0 %610  ;;  %v832_v62 = vld [vmem:[%s913_s0] sm:$0x3f] }
 0x2d4   :  { %v612_v5 = vadd.f32 %v611_v4, %v608_v63  ;;  %v614_v7 = vsub.f32 %v611_v4, %v608_v63 }
 0x2d5   :  { %v598_v8 = vmul.f32 0.5, %v597_v1  ;;  %v600_v11 = vmul.f32 1.2, %v599_v2  ;;  %v20_v1 = vld [vmem:[%s913_s0 + $0x8] sm:$0x3f] }
 0x2d6   :  { %v613_v12 = vmul.f32 0.5, %v612_v5  ;;  %v615_v13 = vmul.f32 1.2, %v614_v7  ;;  %v574_v14 = vpop.xlane.xlu1 %573  ;;  %v841_v2 = vld [vmem:[%s914_s1] sm:$0x3f] }
 0x2d7   :  { %v601_v15 = vmul.f32 0.5, %v600_v11  ;;  %v575_v16 = vmax.f32 %v574_v14, 0.0  ;;  %v579_v17 = vpop.xlane.xlu0 %578  ;;  %v517_v11 = vrot.slane %v841_v2, 1 }
 0x2d8   :  { %v616_v18 = vmul.f32 0.5, %v615_v13  ;;  %v580_v19 = vmin.f32 %v579_v17, 1.0  ;;  %v527_v13 = vrot.slane %v841_v2, 6 }
 0x2d9   :  { %v602_v20 = vsub.f32 %v598_v8, %v601_v15  ;;  %v604_v21 = vadd.f32 %v601_v15, %v598_v8 }
 0x2da   :  { %v617_v22 = vsub.f32 %v613_v12, %v616_v18  ;;  %v619_v23 = vadd.f32 %v616_v18, %v613_v12  ;;  %v622_v24 = vsel %vm621_vm12, %v575_v16, %v580_v19  ;;  %v584_v25 = vpop.xlane.xlu1 %583 }
 0x2db   :  { %v603_v26 = vmax.f32 %v602_v20, 0.0  ;;  %v585_v27 = vmax.f32 %v584_v25, 0.0  ;;  %v588_v28 = vpop.xlane.xlu0 %587  ;;  %v605_v32 = vmin.f32 %v604_v21, 1.0  ;;  %v408_v21 = vsub.s32 0, %v705_v3 }
 0x2dc   :  { %v589_v33 = vmin.f32 %v588_v28, 1.0  ;;  %v618_v34 = vmax.f32 %v617_v22, 0.0  ;;  %v620_v36 = vmin.f32 %v619_v23, 1.0  ;;  %v412_v22 = vsub.s32 2, %v705_v3 }
 0x2dd   :  { %v624_v35 = vsel %vm623_vm13, %v622_v24, %v585_v27 }
 0x2de   :  { %v626_v37 = vsel %vm625_vm14, %v624_v35, %v589_v33  ;;  %v229_v38 = vpop.permute.xlu1 %228 }
 0x2df   :  { %v628_v39 = vsel %vm627_vm15, %v626_v37, %v603_v26  ;;  %v231_v42 = vpop.permute.xlu0 %230 }
 0x2e0   :  { %v630_v40 = vsel %vm629_vm0, %v628_v39, %v605_v32  ;;  %v234_v46 = vsel %vm232_vm2, %v231_v42, %v229_v38  ;;  %v233_v52 = vsel %vm232_vm2, %v229_v38, %v231_v42  ;;  %vm537_vm2 = vcmask 1041408  }
 0x2e1   :  { %v632_v41 = vsel %vm631_vm1, %v630_v40, %v618_v34  ;;  %v240_v50 = vsel %vm66_vm3, %v234_v46, 1.0  ;;  %vm548_vm3 = vcmask 1044480  }
 0x2e2   :  { %v634_v43 = vsel %vm633_vm6, %v632_v41, %v620_v36  ;;  %v242_v44 = vpop.permute.xlu1 %241 }
 0x2e3   :  { %v635_v45 = vmul.f32 16.0, %v634_v43 }
 0x2e5   :  { %v649_v47 = vtrunc.f32 %v635_v45 }
 0x2e6   :  { %v244_v48 = vpop.permute.xlu1 %243 }
 0x2e7   :  { %v650_v49 = vcvt.f32.s32 %v649_v47  ;;  %v246_v51 = vsel %vm245_vm4, %v242_v44, %v244_v48  ;;  %v247_v30 = vsel %vm245_vm4, %v244_v48, %v242_v44  ;;  %vm375_vm4 = vcmp.lt.s32.totalorder %v714_v9, 64 }
 0x2e8   :  { %v252_v53 = vsel %vm63_vm5, %v247_v30, 1.0  ;;  %v255_v54 = vmin.f32 %v240_v50, %v246_v51  ;;  %vm71_vm5 = vcmp.ge.s32.totalorder %v714_v9, 64 }
 0x2e9   :  { %638 = vst.msk [vmem:[%s912_s5] sm:$0x3] %vm637_vm7, %v650_v49  ;;  %v254_v55 = vmin.f32 %v233_v52, %v252_v53 }
 0x2eb   :  { %v258_v56 = vcombine.low %v254_v55, %v255_v54 }
 0x2ed   :  { %v265_v31 = vrot.slane %v258_v56, %v711_v6 }
 0x2ef   :  { %v267_v60 = vmin.f32 %v732_v29, %v265_v31  ;;  %v846_v29 = vld [vmem:[%s914_s1 + $0x8] sm:$0x3f] }
 0x2f0   :  { %v518_v12 = vrot.slane %v846_v29, 1  ;;  %v528_v14 = vrot.slane %v846_v29, 6 }
 0x2f1   :  { %v404_v61 = vsub.f32 1.0, %v267_v60  ;;  %v494_v44 = vrot.slane %v267_v60, %v711_v6 }
 0x2f3   :  { %v429_v63 = vrot.slane %v404_v61, %v825_v57  ;;  %v433_v0 = vrot.slane %v404_v61, %v432_v58  ;;  %v409_v27 = vrot.slane %v404_v61, %v408_v21  ;;  %v413_v35 = vrot.slane %v404_v61, %v412_v22 }
 0x2f4   :  { %v495_v54 = vcombine.high %v494_v44, %v494_v44 }
 0x2f5   :  { %v439_v4 = vrot.slane %v429_v63, %v825_v57  ;;  %v443_v5 = vrot.slane %v433_v0, %v825_v57  ;;  %v419_v37 = vrot.slane %v409_v27, %v408_v21  ;;  %v423_v39 = vrot.slane %v413_v35, %v408_v21 }
 0x2f7   :  { %v444_v7 = vmul.f32 %v439_v4, %v832_v62  ;;  %v445_v8 = vmul.f32 %v443_v5, %v20_v1  ;;  %v424_v10 = vmul.f32 %v419_v37, %v832_v62  ;;  %v425_v43 = vmul.f32 %v423_v39, %v20_v1 }
 0x2f9   :  { %v523_v15 = vrot.slane %v444_v7, 1  ;;  %v524_v16 = vrot.slane %v445_v8, 1  ;;  %v511_v50 = vrot.slane %v424_v10, 4  ;;  %v512_v55 = vrot.slane %v425_v43, 4 }
 0x2fb   :  { %v546_v17 = vsel %vm537_vm2, %v517_v11, %v523_v15  ;;  %v547_v18 = vsel %vm537_vm2, %v518_v12, %v524_v16 }
 0x2fc   :  { %v549_v19 = vsel %vm548_vm3, %v546_v17, %v527_v13  ;;  %v550_v20 = vsel %vm548_vm3, %v547_v18, %v528_v14 }
 0x2fd   :  { %560 = vst [vmem:[%s915_s4 + $0x10] sm:$0xff] %v549_v19  ;;  %561 = vst [vmem:[%s915_s4 + $0x18] sm:$0xff] %v550_v20 }
 0x312   :  { %v372_v23 = vpop.permute.xlu0 %371 }
 0x314   :  { %v374_v24 = vpop.permute.xlu1 %373 }
 0x315   :  { %v376_v25 = vsel %vm375_vm4, %v372_v23, %v374_v24  ;;  %v377_v26 = vsel %vm375_vm4, %v374_v24, %v372_v23 }
 0x316   :  { %v383_v28 = vsel %vm74_vm8, %v377_v26, 1.0  ;;  %v388_v32 = vsel %vm71_vm5, %v377_v26, 1.0 }
 0x317   :  { %v390_v33 = vmin.f32 %v376_v25, %v388_v32  ;;  %v391_v34 = vmin.f32 %v383_v28, %v376_v25 }
 0x319   :  { %v394_v36 = vcombine.low %v390_v33, %v391_v34 }
 0x31b   :  { %v401_v38 = vrot.slane %v394_v36, %v711_v6 }
 0x31d   :  { %v403_v9 = vmin.f32 %v804_v59, %v401_v38 }
 0x31f   :  { %v450_v3 = vrot.slane %v403_v9, %v408_v21  ;;  %v454_v40 = vrot.slane %v403_v9, %v412_v22  ;;  %v470_v41 = vrot.slane %v403_v9, %v825_v57  ;;  %v474_v42 = vrot.slane %v403_v9, %v432_v58 }
 0x320   :  { %v498_v45 = vcombine.low %v403_v9, %v403_v9 }
 0x321   :  { %v460_v46 = vrot.slane %v450_v3, %v408_v21  ;;  %v464_v47 = vrot.slane %v454_v40, %v408_v21  ;;  %v480_v48 = vrot.slane %v470_v41, %v825_v57  ;;  %v484_v49 = vrot.slane %v474_v42, %v825_v57 }
 0x322   :  { %v505_v59 = vrot.slane %v498_v45, %v711_v6 }
 0x323   :  { %v465_v51 = vmul.f32 %v460_v46, %v832_v62  ;;  %v466_v30 = vmul.f32 %v464_v47, %v20_v1  ;;  %v485_v52 = vmul.f32 %v480_v48, %v832_v62  ;;  %v486_v53 = vmul.f32 %v484_v49, %v20_v1 }
 0x324   :  { %v506_v56 = vcombine.high %v505_v59, %v505_v59  ;;  %v538_v31 = vsel %vm537_vm2, %v494_v44, %v505_v59 }
 0x325   :  { %v533_v58 = vrot.slane %v485_v52, 7  ;;  %v534_v60 = vrot.slane %v486_v53, 7  ;;  %v541_v57 = vsel %vm540_vm9, %v538_v31, %v511_v50  ;;  %v552_v61 = vsel %vm551_vm11, %v465_v51, %v450_v3 }
 0x326   :  { %v539_v63 = vsel %vm537_vm2, %v495_v54, %v506_v56  ;;  %v544_v6 = vsel %vm543_vm10, %v541_v57, %v517_v11  ;;  %v553_v62 = vsel %vm551_vm11, %v466_v30, %v454_v40 }
 0x327   :  { %v542_v0 = vsel %vm540_vm9, %v539_v63, %v512_v55  ;;  %v554_v1 = vsel %vm540_vm9, %v552_v61, %v533_v58  ;;  %v555_v4 = vsel %vm540_vm9, %v553_v62, %v534_v60  ;;  %558 = vst [vmem:[%s915_s4] sm:$0xff] %v544_v6 }
 0x328   :  { %v545_v5 = vsel %vm543_vm10, %v542_v0, %v518_v12  ;;  %v556_v2 = vsel %vm543_vm10, %v554_v1, %v470_v41  ;;  %v557_v7 = vsel %vm543_vm10, %v555_v4, %v474_v42 }
 0x329   :  { %559 = vst [vmem:[%s915_s4 + $0x8] sm:$0xff] %v545_v5  ;;  %562 = vst [vmem:[%s915_s4 + $0x20] sm:$0xff] %v556_v2 }
 0x32a   :  { %563 = vst [vmem:[%s915_s4 + $0x28] sm:$0xff] %v557_v7 }

</bundles_post_ra>
